<compile_context>
chip_gen: v6e
topology: v6e:2x2x1
jax: 0.10.0
libtpu: 0.0.40
codegen_flags: <defaults>
</compile_context>

<pallas_src>
import functools

import jax
import jax.numpy as jnp
from jax.experimental import pallas as pl
from jax.experimental.pallas import tpu as pltpu

_NEG_BIG = -1e30  # padded-logit fill; exp() underflows to exactly 0 in f32


def _round_up(n, m):
    return ((n + m - 1) // m) * m


def _net_mnist_kernel(x_ref, w1_ref, b1_ref, w2_ref, b2_ref, o_ref):
    # x_ref: (TB, 784)   w1_ref: (784, 128)  b1_ref: (1, 128)
    # w2_ref: (128, 128) b2_ref: (1, 128)    o_ref: (TB, 10)
    h = jnp.dot(x_ref[...], w1_ref[...], preferred_element_type=jnp.float32)
    h = jnp.maximum(h + b1_ref[...], 0.0)            # padded hidden lanes stay 0
    logits = jnp.dot(h, w2_ref[...], preferred_element_type=jnp.float32)
    logits = logits + b2_ref[...]                    # padded lanes == -1e30 via b2

    # Numerically stable log_softmax; padded lanes contribute exp(-huge) == 0.
    m = jnp.max(logits, axis=-1, keepdims=True)
    shifted = logits - m
    lse = jnp.log(jnp.sum(jnp.exp(shifted), axis=-1, keepdims=True))
    out = shifted - lse                              # (TB, 128)

    # Store only the valid lanes (masked vst; store slot has huge slack — the
    # kernel is bound by the 3136 B/row input DMA).
    o_ref[...] = out[:, : o_ref.shape[-1]]


def net_mnist_forward(x, w1, b1, w2, b2, *, tb_max=2048, input_dtype=jnp.float32):
    """x: (B, 1, 28, 28).  w1: (784, 50), b1: (50,), w2: (50, 10), b2: (10,)
    (weights pre-transposed for row-major matmul).  Returns (B, 10) log-probs.

    input_dtype=jnp.bfloat16 casts x / W1 only (f32 accumulation kept); this
    halves the dominant input HBM read at ~1e-2 absolute tolerance."""
    B = x.shape[0]
    x_flat = x.reshape(B, -1).astype(input_dtype)     # (B, 784), torch.flatten order
    IN = x_flat.shape[1]
    HID = w1.shape[1]
    OUT = w2.shape[1]
    IN_P = _round_up(IN, 128)                          # lane-padded x tile (VMEM layout)
    HID_P = _round_up(HID, 128)                        # 50  -> 128 (lane-dense hidden)
    OUT_P = _round_up(OUT, 128)                        # 10  -> 128 (compute only)

    # Zero-pad parameters to lane-dense shapes; padded W rows/cols contribute 0.
    w1p = jnp.zeros((IN, HID_P), input_dtype).at[:, :HID].set(w1.astype(input_dtype))
    b1p = jnp.zeros((1, HID_P), jnp.float32).at[:, :HID].set(
        b1.astype(jnp.float32).reshape(1, HID))
    w2p = jnp.zeros((HID_P, OUT_P), jnp.float32).at[:HID, :OUT].set(
        w2.astype(jnp.float32))
    # Mask baked into the bias: padded output lanes get -1e30 so the in-kernel
    # log_softmax over 128 lanes equals the reference log_softmax over 10.
    b2p = jnp.full((1, OUT_P), _NEG_BIG, jnp.float32).at[:, :OUT].set(
        b2.astype(jnp.float32).reshape(1, OUT))

    # --- Generation-aware tiling -------------------------------------------
    try:
        vmem_cap = int(pltpu.get_tpu_info().vmem_capacity_bytes)
    except Exception:
        vmem_cap = 64 * 1024 * 1024                    # conservative fallback
    vmem_budget = min(vmem_cap // 2, 64 * 1024 * 1024)  # <=64 MiB v5e/v6e, 32 MiB v7x

    x_bytes = jnp.dtype(input_dtype).itemsize
    # Resident (double-buffered by default) weights + biases, lane/sublane padded.
    weight_vmem = 4 * 2 * (IN * HID_P + HID_P * OUT_P + 8 * HID_P + 8 * OUT_P) \
        + (x_bytes - 4) * 2 * IN * HID_P * 0           # (W1 dtype folded below)
    weight_vmem = 2 * (x_bytes * IN * HID_P + 4 * (HID_P * OUT_P + 8 * HID_P + 8 * OUT_P))
    # Per batch-row VMEM: double-buffered x tile (lane-padded) + output tile.
    row_vmem = 2 * (x_bytes * IN_P + 4 * OUT_P)

    # Largest TB fitting in ~half the budget; multiple of 8 (sublane).
    tb_fit = max(8, ((vmem_budget // 2 - weight_vmem) // row_vmem) // 8 * 8)
    # Prefer >=2 grid steps so ("parallel",) spans both v7x TensorCores.
    tb_split = _round_up(pl.cdiv(B, 2), 8)
    TB = min(tb_max, tb_fit, tb_split)
    TB = max(8, (TB // 8) * 8)

    Bp = _round_up(B, TB)
    if Bp != B:
        x_flat = jnp.pad(x_flat, ((0, Bp - B), (0, 0)))
    grid = (Bp // TB,)

    vmem_need = TB * row_vmem + weight_vmem
    vmem_limit = int(min(vmem_budget, max(16 * 1024 * 1024, int(vmem_need * 1.4))))

    cost = pl.CostEstimate(
        flops=2 * Bp * (IN * HID_P + HID_P * OUT_P),
        transcendentals=Bp * OUT_P,
        bytes_accessed=(x_bytes * (Bp * IN + IN * HID_P)
                        + 4 * (HID_P * OUT_P + HID_P + OUT_P + Bp * OUT)),
    )

    out = pl.pallas_call(
        _net_mnist_kernel,
        out_shape=jax.ShapeDtypeStruct((Bp, OUT), jnp.float32),
        grid=grid,
        in_specs=[
            pl.BlockSpec((TB, IN), lambda i: (i, 0)),        # x tile (pipelined)
            pl.BlockSpec((IN, HID_P), lambda i: (0, 0)),     # W1 (resident)
            pl.BlockSpec((1, HID_P), lambda i: (0, 0)),      # b1 (resident)
            pl.BlockSpec((HID_P, OUT_P), lambda i: (0, 0)),  # W2 (resident)
            pl.BlockSpec((1, OUT_P), lambda i: (0, 0)),      # b2 (resident, holds mask)
        ],
        out_specs=pl.BlockSpec((TB, OUT), lambda i: (i, 0)), # valid lanes only
        compiler_params=pltpu.CompilerParams(
            dimension_semantics=("parallel",),               # shards batch across TCs
            vmem_limit_bytes=vmem_limit,
        ),
        cost_estimate=cost,
    )(x_flat, w1p, b1p, w2p, b2p)

    return out if Bp == B else out[:B]


def _reference(x, w1, b1, w2, b2):
    x_flat = x.reshape(x.shape[0], -1)
    h = jnp.maximum(x_flat @ w1 + b1, 0.0)
    logits = h @ w2 + b2
    return jax.nn.log_softmax(logits, axis=1)


if __name__ == "__main__":
    key = jax.random.PRNGKey(0)
    k_x, k_w1, k_b1, k_w2, k_b2 = jax.random.split(key, 5)

    B, C, H, W = 8, 1, 28, 28          # MNIST-shaped input implied by Linear(784, 50)
    IN, HID, OUT = 784, 50, 10

    x = jax.random.normal(k_x, (B, C, H, W), dtype=jnp.float32)

    # Deterministic synthetic parameters (PyTorch-style uniform fan-in scale).
    lim1 = 1.0 / jnp.sqrt(IN)
    lim2 = 1.0 / jnp.sqrt(HID)
    w1 = jax.random.uniform(k_w1, (IN, HID), jnp.float32, -lim1, lim1)
    b1 = jax.random.uniform(k_b1, (HID,), jnp.float32, -lim1, lim1)
    w2 = jax.random.uniform(k_w2, (HID, OUT), jnp.float32, -lim2, lim2)
    b2 = jax.random.uniform(k_b2, (OUT,), jnp.float32, -lim2, lim2)

    ref = _reference(x, w1, b1, w2, b2)

    # Default f32 path: exact-semantics forward, tight tolerance vs reference.
    out = net_mnist_forward(x, w1, b1, w2, b2)
    jax.block_until_ready(out)
    assert out.shape == (B, OUT)
    assert jnp.allclose(out, ref, atol=1e-5, rtol=1e-5), "mismatch vs JAX reference"

    # Optional bf16-input path (perf lever, esp. v5e): loose sanity check only.
    out_bf16 = net_mnist_forward(x, w1, b1, w2, b2, input_dtype=jnp.bfloat16)
    jax.block_until_ready(out_bf16)
    assert out_bf16.shape == (B, OUT)
    assert float(jnp.max(jnp.abs(out_bf16 - ref))) < 0.25, "bf16 path diverged"

    print("KERNEL_OK")
</pallas_src>

<mosaic_0001>
module attributes {stable_mosaic.version = 11 : i64} {
  func.func @_net_mnist_kernel(%arg0: i32, %arg1: memref<8x784xf32, #tpu.memory_space<vmem>>, %arg2: memref<784x128xf32, #tpu.memory_space<vmem>>, %arg3: memref<1x128xf32, #tpu.memory_space<vmem>>, %arg4: memref<128x128xf32, #tpu.memory_space<vmem>>, %arg5: memref<1x128xf32, #tpu.memory_space<vmem>>, %arg6: memref<8x10xf32, #tpu.memory_space<vmem>>) attributes {dimension_semantics = [#tpu.dimension_semantics<parallel>], iteration_bounds = array<i64: 1>, scalar_prefetch = 0 : i64, scratch_operands = 0 : i64, tpu.core_type = #tpu.core_type<tc>, window_params = [{transform_indices = @transform_0, window_bounds = array<i64: 8, 784>}, {pipeline_mode = #tpu.pipeline_mode<synchronous>, transform_indices = @transform_1, window_bounds = array<i64: 784, 128>}, {pipeline_mode = #tpu.pipeline_mode<synchronous>, transform_indices = @transform_2, window_bounds = array<i64: 1, 128>}, {pipeline_mode = #tpu.pipeline_mode<synchronous>, transform_indices = @transform_3, window_bounds = array<i64: 128, 128>}, {pipeline_mode = #tpu.pipeline_mode<synchronous>, transform_indices = @transform_4, window_bounds = array<i64: 1, 128>}, {transform_indices = @transform_5, window_bounds = array<i64: 8, 10>}]} {
    %c0 = arith.constant 0 : index
    %c0_0 = arith.constant 0 : index
    %0 = vector.load %arg1[%c0, %c0_0] : memref<8x784xf32, #tpu.memory_space<vmem>>, vector<8x784xf32>
    %c0_1 = arith.constant 0 : index
    %c0_2 = arith.constant 0 : index
    %1 = vector.load %arg2[%c0_1, %c0_2] : memref<784x128xf32, #tpu.memory_space<vmem>>, vector<784x128xf32>
    %cst = arith.constant dense<0.000000e+00> : vector<8x128xf32>
    %2 = tpu.matmul %0, %1, %cst {dimension_numbers = #tpu.dot_dimension_numbers<[1], [0], [0], [1], [0, 0, 1, 1], [], []>} : vector<8x784xf32>, vector<784x128xf32>, vector<8x128xf32> -> vector<8x128xf32>
    %c0_3 = arith.constant 0 : index
    %c0_4 = arith.constant 0 : index
    %3 = vector.load %arg3[%c0_3, %c0_4] : memref<1x128xf32, #tpu.memory_space<vmem>>, vector<1x128xf32>
    %4 = vector.broadcast %3 : vector<1x128xf32> to vector<8x128xf32>
    %5 = arith.addf %2, %4 : vector<8x128xf32>
    %cst_5 = arith.constant 0.000000e+00 : f32
    %6 = vector.broadcast %cst_5 : f32 to vector<8x128xf32>
    %7 = arith.maximumf %5, %6 : vector<8x128xf32>
    %c0_6 = arith.constant 0 : index
    %c0_7 = arith.constant 0 : index
    %8 = vector.load %arg4[%c0_6, %c0_7] : memref<128x128xf32, #tpu.memory_space<vmem>>, vector<128x128xf32>
    %cst_8 = arith.constant dense<0.000000e+00> : vector<8x128xf32>
    %9 = tpu.matmul %7, %8, %cst_8 {dimension_numbers = #tpu.dot_dimension_numbers<[1], [0], [0], [1], [0, 0, 1, 1], [], []>} : vector<8x128xf32>, vector<128x128xf32>, vector<8x128xf32> -> vector<8x128xf32>
    %c0_9 = arith.constant 0 : index
    %c0_10 = arith.constant 0 : index
    %10 = vector.load %arg5[%c0_9, %c0_10] : memref<1x128xf32, #tpu.memory_space<vmem>>, vector<1x128xf32>
    %11 = vector.broadcast %10 : vector<1x128xf32> to vector<8x128xf32>
    %12 = arith.addf %9, %11 : vector<8x128xf32>
    %cst_11 = arith.constant dense<0xFF800000> : vector<8xf32>
    %13 = vector.multi_reduction <maximumf>, %12, %cst_11 [1] : vector<8x128xf32> to vector<8xf32>
    %14 = vector.shape_cast %13 : vector<8xf32> to vector<8x1xf32>
    %15 = vector.broadcast %14 : vector<8x1xf32> to vector<8x128xf32>
    %16 = arith.subf %12, %15 : vector<8x128xf32>
    %17 = math.exp %16 : vector<8x128xf32>
    %cst_12 = arith.constant dense<0.000000e+00> : vector<8xf32>
    %18 = vector.multi_reduction <add>, %17, %cst_12 [1] : vector<8x128xf32> to vector<8xf32>
    %19 = vector.shape_cast %18 : vector<8xf32> to vector<8x1xf32>
    %20 = math.log %19 : vector<8x1xf32>
    %21 = vector.broadcast %20 : vector<8x1xf32> to vector<8x128xf32>
    %22 = arith.subf %16, %21 : vector<8x128xf32>
    %23 = vector.extract_strided_slice %22 {offsets = [0, 0], sizes = [8, 10], strides = [1, 1]} : vector<8x128xf32> to vector<8x10xf32>
    %c0_13 = arith.constant 0 : index
    %c0_14 = arith.constant 0 : index
    %24 = vector.load %arg6[%c0_13, %c0_14] : memref<8x10xf32, #tpu.memory_space<vmem>>, vector<8x10xf32>
    tpu.vector_store %arg6[%c0_13, %c0_14], %23 {strides = array<i32>} : memref<8x10xf32, #tpu.memory_space<vmem>>, vector<8x10xf32>,
    return
  }
  func.func @transform_0(%arg0: i32) -> (i32, i32) {
    %c0_i32 = arith.constant 0 : i32
    %c0_i32_0 = arith.constant 0 : i32
    return %arg0, %c0_i32 : i32, i32
  }
  func.func @transform_1(%arg0: i32) -> (i32, i32) {
    %c0_i32 = arith.constant 0 : i32
    %c0_i32_0 = arith.constant 0 : i32
    %c0_i32_1 = arith.constant 0 : i32
    return %c0_i32, %c0_i32_0 : i32, i32
  }
  func.func @transform_2(%arg0: i32) -> (i32, i32) {
    %c0_i32 = arith.constant 0 : i32
    %c0_i32_0 = arith.constant 0 : i32
    %c0_i32_1 = arith.constant 0 : i32
    return %c0_i32, %c0_i32_0 : i32, i32
  }
  func.func @transform_3(%arg0: i32) -> (i32, i32) {
    %c0_i32 = arith.constant 0 : i32
    %c0_i32_0 = arith.constant 0 : i32
    %c0_i32_1 = arith.constant 0 : i32
    return %c0_i32, %c0_i32_0 : i32, i32
  }
  func.func @transform_4(%arg0: i32) -> (i32, i32) {
    %c0_i32 = arith.constant 0 : i32
    %c0_i32_0 = arith.constant 0 : i32
    %c0_i32_1 = arith.constant 0 : i32
    return %c0_i32, %c0_i32_0 : i32, i32
  }
  func.func @transform_5(%arg0: i32) -> (i32, i32) {
    %c0_i32 = arith.constant 0 : i32
    %c0_i32_0 = arith.constant 0 : i32
    return %arg0, %c0_i32 : i32, i32
  }
}

</mosaic_0001>

<bundles_post_ra>
// kernel: tpu_custom_call.1
= control target key start
LH: loop header
LB: loop body
LE: loop exit
PB: predicated region body
PF: predicated region fallthrough
CT: control target
= control target key end

     0   :  { %10 = vsyncpa [#allocation3], 0  ;;  %s922_s0 = inlined_call_operand.hbm [shape: f32[8,784], index: 0, kind: input, shape index: {}]   ;;  %s923_s1 = inlined_call_operand.hbm [shape: f32[784,128], index: 1, kind: input, shape index: {}]   ;;  %s924_s2 = inlined_call_operand.vmem [shape: f32[1,128], index: 2, kind: input, shape index: {}]   ;;  %s925_s3 = inlined_call_operand.hbm [shape: f32[128,128], index: 3, kind: input, shape index: {}]   ;;  %s926_s4 = inlined_call_operand.vmem [shape: f32[1,128], index: 4, kind: input, shape index: {}]   ;;  %s927_s5 = inlined_call_operand.hbm [shape: f32[8,10], index: 5, kind: output, shape index: {}]  }
   0x1   :  { %11 = vsyncpa [#allocation6], 0 }
   0x2   :  { %12 = vsyncpa [#allocation4], 0  ;;  %s846_s18 = smov [#allocation5]  }
   0x3   :  { %s28_s19 = sshll.u32 %s846_s18, 4  ;;  %s29_s19 = int_to_ptr.vmem [resolvable:$true] %s28_s19 }
   0x4   :  { %s768_s20 = scalar_lea.vmem %s29_s19, 12544  ;;  %p773_p1 = scmp.lt.s32.totalorder %s29_s19, %s29_s19 }
   0x5   :  { %p769_p0 = scmp.ne.s32.totalorder %s29_s19, %s768_s20  ;;  %p774_p2 = scmp.lt.s32.totalorder %s768_s20, %s768_s20 }
   0x7   :  { %p775_p3 = por %p774_p2, %p773_p1 }
   0x9   :  { %p776_p4 = pnand %p775_p3, %p769_p0 }
   0xb   :  { %779 = shalt.err (!%p776_p4)
}
   0xc   :  { %s847_s21 = smov 128   ;;  %s848_s22 = smov 8  }
   0xd   :  { %34 = dma.hbm_to_vmem [thread:$0]  %s923_s1, 12544, %s29_s19, [#allocation6], %s847_s21, %s847_s21, %s848_s22  }
   0xe   :  { %s849_s25 = smov [#allocation2]   ;;  %s850_s27 = smov [#allocation7]  }
   0xf   :  { %s19_s26 = sshll.u32 %s849_s25, 4  ;;  %s42_s28 = sshll.u32 %s850_s27, 4  ;;  %s20_s26 = int_to_ptr.vmem [resolvable:$true] %s19_s26  ;;  %s43_s28 = int_to_ptr.vmem [resolvable:$true] %s42_s28 }
  0x10   :  { %s788_s29 = scalar_lea.vmem %s20_s26, 896  ;;  %p793_p6 = scmp.lt.s32.totalorder %s20_s26, %s20_s26 }
  0x11   :  { %p789_p5 = scmp.ne.s32.totalorder %s20_s26, %s788_s29  ;;  %p794_p7 = scmp.lt.s32.totalorder %s788_s29, %s788_s29 }
  0x13   :  { %p795_p8 = por %p794_p7, %p793_p6 }
  0x15   :  { %p796_p9 = pnand %p795_p8, %p789_p5 }
  0x17   :  { %799 = shalt.err (!%p796_p9)
}
  0x18   :  { %22 = dma.hbm_to_vmem [thread:$0]  %s922_s0, 896, %s20_s26, [#allocation3]  }
  0x19   :  { %s808_s7 = scalar_lea.vmem %s43_s28, 2048  ;;  %p813_p11 = scmp.lt.s32.totalorder %s43_s28, %s43_s28 }
  0x1a   :  { %p809_p10 = scmp.ne.s32.totalorder %s43_s28, %s808_s7  ;;  %p814_p12 = scmp.lt.s32.totalorder %s808_s7, %s808_s7 }
  0x1c   :  { %p815_p13 = por %p814_p12, %p813_p11 }
  0x1e   :  { %p816_p0 = pnand %p815_p13, %p809_p10 }
  0x20   :  { %819 = shalt.err (!%p816_p0)
}
  0x21   :  { %48 = dma.hbm_to_vmem [thread:$0]  %s925_s3, 2048, %s43_s28, [#allocation6], %s847_s21, %s847_s21, %s848_s22  }
  0x22   :  { %840 = dma.done.wait [#allocation3], 896  }
  0x23   :  { %841 = vsyncadd [#allocation3], 4294966400 }
  0x24   :  { %842 = dma.done.wait [#allocation6], 14592  }
  0x25   :  { %843 = vsyncadd [#allocation6], 4294952704  ;;  %v98_v0 = vld [vmem:[#allocation5 + $0xf8] sm:$0xff]  ;;  %v97_v2 = vld [vmem:[#allocation5 + $0xf0] sm:$0xff]  ;;  %vm172_vm0 = vcmask 130048   ;;  %vm852_vm1 = vmmov 0  }
  0x26   :  { %v82_v1 = vld [vmem:[#allocation5 + $0x78] sm:$0xff]  ;;  %581 = vmatprep.subr.mxu0 %v98_v0  ;;  %v81_v4 = vld [vmem:[#allocation5 + $0x70] sm:$0xff]  ;;  %v96_v6 = vld [vmem:[#allocation5 + $0xe8] sm:$0xff]  ;;  %vm560_vm2 = vcmask 80896  }
  0x27   :  { %v130_v3 = vld [vmem:[#allocation5 + $0x1f8] sm:$0xff]  ;;  %582 = vmatpush3.msra.mxu0 %v82_v1  ;;  %v129_v7 = vld [vmem:[#allocation5 + $0x1f0] sm:$0xff]  ;;  %v80_v8 = vld [vmem:[#allocation5 + $0x68] sm:$0xff] }
  0x28   :  { %v114_v5 = vld [vmem:[#allocation5 + $0x178] sm:$0xff]  ;;  %616 = vmatprep.subr.mxu1 %v130_v3  ;;  %583 = vmatprep.subr.mxu0 %v97_v2  ;;  %v113_v9 = vld [vmem:[#allocation5 + $0x170] sm:$0xff]  ;;  %v128_v10 = vld [vmem:[#allocation5 + $0x1e8] sm:$0xff] }
  0x29   :  { %617 = vmatpush3.msra.mxu1 %v114_v5  ;;  %584 = vmatpush3.msra.mxu0 %v81_v4  ;;  %v95_v11 = vld [vmem:[#allocation5 + $0xe0] sm:$0xff]  ;;  %v112_v12 = vld [vmem:[#allocation5 + $0x168] sm:$0xff]  ;;  %v94_v15 = vld [vmem:[#allocation5 + $0xd8] sm:$0xff] }
  0x2a   :  { %618 = vmatprep.subr.mxu1 %v129_v7  ;;  %585 = vmatprep.subr.mxu0 %v96_v6  ;;  %v79_v13 = vld [vmem:[#allocation5 + $0x60] sm:$0xff]  ;;  %v78_v17 = vld [vmem:[#allocation5 + $0x58] sm:$0xff]  ;;  %v93_v19 = vld [vmem:[#allocation5 + $0xd0] sm:$0xff] }
  0x2b   :  { %619 = vmatpush3.msra.mxu1 %v113_v9  ;;  %v127_v14 = vld [vmem:[#allocation5 + $0x1e0] sm:$0xff]  ;;  %586 = vmatpush3.msra.mxu0 %v80_v8  ;;  %v126_v18 = vld [vmem:[#allocation5 + $0x1d8] sm:$0xff]  ;;  %v77_v21 = vld [vmem:[#allocation5 + $0x50] sm:$0xff] }
  0x2c   :  { %620 = vmatprep.subr.mxu1 %v128_v10  ;;  %v111_v16 = vld [vmem:[#allocation5 + $0x160] sm:$0xff]  ;;  %587 = vmatprep.subr.mxu0 %v95_v11  ;;  %v110_v20 = vld [vmem:[#allocation5 + $0x158] sm:$0xff]  ;;  %v125_v22 = vld [vmem:[#allocation5 + $0x1d0] sm:$0xff] }
  0x2d   :  { %621 = vmatpush3.msra.mxu1 %v112_v12  ;;  %588 = vmatpush3.msra.mxu0 %v79_v13  ;;  %v92_v23 = vld [vmem:[#allocation5 + $0xc8] sm:$0xff]  ;;  %v109_v24 = vld [vmem:[#allocation5 + $0x150] sm:$0xff]  ;;  %v91_v27 = vld [vmem:[#allocation5 + $0xc0] sm:$0xff] }
  0x2e   :  { %622 = vmatprep.subr.mxu1 %v127_v14  ;;  %589 = vmatprep.subr.mxu0 %v94_v15  ;;  %v76_v25 = vld [vmem:[#allocation5 + $0x48] sm:$0xff]  ;;  %v75_v29 = vld [vmem:[#allocation5 + $0x40] sm:$0xff]  ;;  %v90_v31 = vld [vmem:[#allocation5 + $0xb8] sm:$0xff]  ;;  %v851_v14 = vmov 0.0  }
  0x2f   :  { %623 = vmatpush3.msra.mxu1 %v111_v16  ;;  %590 = vmatpush3.msra.mxu0 %v78_v17  ;;  %v124_v26 = vld [vmem:[#allocation5 + $0x1c8] sm:$0xff]  ;;  %v123_v30 = vld [vmem:[#allocation5 + $0x1c0] sm:$0xff]  ;;  %v74_v33 = vld [vmem:[#allocation5 + $0x38] sm:$0xff] }
  0x30   :  { %624 = vmatprep.subr.mxu1 %v126_v18  ;;  %591 = vmatprep.subr.mxu0 %v93_v19  ;;  %v108_v28 = vld [vmem:[#allocation5 + $0x148] sm:$0xff]  ;;  %v107_v32 = vld [vmem:[#allocation5 + $0x140] sm:$0xff]  ;;  %v122_v34 = vld [vmem:[#allocation5 + $0x1b8] sm:$0xff] }
  0x31   :  { %625 = vmatpush3.msra.mxu1 %v110_v20  ;;  %592 = vmatpush3.msra.mxu0 %v77_v21  ;;  %v89_v35 = vld [vmem:[#allocation5 + $0xb0] sm:$0xff]  ;;  %v106_v36 = vld [vmem:[#allocation5 + $0x138] sm:$0xff]  ;;  %v88_v39 = vld [vmem:[#allocation5 + $0xa8] sm:$0xff] }
  0x32   :  { %626 = vmatprep.subr.mxu1 %v125_v22  ;;  %593 = vmatprep.subr.mxu0 %v92_v23  ;;  %v73_v37 = vld [vmem:[#allocation5 + $0x30] sm:$0xff]  ;;  %v72_v41 = vld [vmem:[#allocation5 + $0x28] sm:$0xff]  ;;  %v87_v43 = vld [vmem:[#allocation5 + $0xa0] sm:$0xff] }
  0x33   :  { %627 = vmatpush3.msra.mxu1 %v109_v24  ;;  %594 = vmatpush3.msra.mxu0 %v76_v25  ;;  %v121_v38 = vld [vmem:[#allocation5 + $0x1b0] sm:$0xff]  ;;  %v120_v42 = vld [vmem:[#allocation5 + $0x1a8] sm:$0xff]  ;;  %v71_v45 = vld [vmem:[#allocation5 + $0x20] sm:$0xff] }
  0x34   :  { %628 = vmatprep.subr.mxu1 %v124_v26  ;;  %595 = vmatprep.subr.mxu0 %v91_v27  ;;  %v105_v40 = vld [vmem:[#allocation5 + $0x130] sm:$0xff]  ;;  %v104_v44 = vld [vmem:[#allocation5 + $0x128] sm:$0xff]  ;;  %v119_v46 = vld [vmem:[#allocation5 + $0x1a0] sm:$0xff] }
  0x35   :  { %629 = vmatpush3.msra.mxu1 %v108_v28  ;;  %596 = vmatpush3.msra.mxu0 %v75_v29  ;;  %v86_v47 = vld [vmem:[#allocation5 + $0x98] sm:$0xff]  ;;  %v103_v48 = vld [vmem:[#allocation5 + $0x120] sm:$0xff]  ;;  %v85_v51 = vld [vmem:[#allocation5 + $0x90] sm:$0xff] }
  0x36   :  { %630 = vmatprep.subr.mxu1 %v123_v30  ;;  %597 = vmatprep.subr.mxu0 %v90_v31  ;;  %v70_v49 = vld [vmem:[#allocation5 + $0x18] sm:$0xff]  ;;  %v69_v53 = vld [vmem:[#allocation5 + $0x10] sm:$0xff]  ;;  %v84_v55 = vld [vmem:[#allocation5 + $0x88] sm:$0xff] }
  0x37   :  { %631 = vmatpush3.msra.mxu1 %v107_v32  ;;  %598 = vmatpush3.msra.mxu0 %v74_v33  ;;  %v118_v50 = vld [vmem:[#allocation5 + $0x198] sm:$0xff]  ;;  %v117_v54 = vld [vmem:[#allocation5 + $0x190] sm:$0xff]  ;;  %v68_v57 = vld [vmem:[#allocation5 + $0x8] sm:$0xff] }
  0x38   :  { %632 = vmatprep.subr.mxu1 %v122_v34  ;;  %599 = vmatprep.subr.mxu0 %v89_v35  ;;  %v102_v52 = vld [vmem:[#allocation5 + $0x118] sm:$0xff]  ;;  %v101_v56 = vld [vmem:[#allocation5 + $0x110] sm:$0xff]  ;;  %v116_v58 = vld [vmem:[#allocation5 + $0x188] sm:$0xff] }
  0x39   :  { %633 = vmatpush3.msra.mxu1 %v106_v36  ;;  %600 = vmatpush3.msra.mxu0 %v73_v37  ;;  %v83_v59 = vld [vmem:[#allocation5 + $0x80] sm:$0xff]  ;;  %v61_v60 = vld [vmem:[#allocation2 + $0x8] sm:$0xff]  ;;  %v100_v62 = vld [vmem:[#allocation5 + $0x108] sm:$0xff] }
  0x3a   :  { %634 = vmatprep.subr.mxu1 %v121_v38  ;;  %601 = vmatprep.subr.mxu0 %v88_v39  ;;  %v67_v61 = vld [vmem:[#allocation5] sm:$0xff]  ;;  %v60_v63 = vld [vmem:[#allocation2] sm:$0xff]  ;;  %v162_v1 = vld [vmem:[#allocation5 + $0x2f8] sm:$0xff] }
  0x3b   :  { %635 = vmatpush3.msra.mxu1 %v105_v40  ;;  %602 = vmatpush3.msra.mxu0 %v72_v41  ;;  %v115_v0 = vld [vmem:[#allocation5 + $0x180] sm:$0xff]  ;;  %v146_v4 = vld [vmem:[#allocation5 + $0x278] sm:$0xff]  ;;  %v161_v6 = vld [vmem:[#allocation5 + $0x2f0] sm:$0xff] }
  0x3c   :  { %636 = vmatprep.subr.mxu1 %v120_v42  ;;  %603 = vmatprep.subr.mxu0 %v87_v43  ;;  %v99_v2 = vld [vmem:[#allocation5 + $0x100] sm:$0xff]  ;;  %v62_v5 = vld [vmem:[#allocation2 + $0x10] sm:$0xff]  ;;  %v145_v7 = vld [vmem:[#allocation5 + $0x270] sm:$0xff] }
  0x3d   :  { %637 = vmatpush3.msra.mxu1 %v104_v44  ;;  %604 = vmatpush3.msra.mxu0 %v71_v45  ;;  %v63_v3 = vld [vmem:[#allocation2 + $0x18] sm:$0xff]  ;;  %v65_v8 = vld [vmem:[#allocation2 + $0x28] sm:$0xff]  ;;  %v160_v9 = vld [vmem:[#allocation5 + $0x2e8] sm:$0xff] }
  0x3e   :  { %638 = vmatprep.subr.mxu1 %v119_v46  ;;  %605 = vmatprep.subr.mxu0 %v86_v47  ;;  %v144_v10 = vld [vmem:[#allocation5 + $0x268] sm:$0xff]  ;;  %v159_v12 = vld [vmem:[#allocation5 + $0x2e0] sm:$0xff]  ;;  %v158_v16 = vld [vmem:[#allocation5 + $0x2d8] sm:$0xff] }
  0x3f   :  { %639 = vmatpush3.msra.mxu1 %v103_v48  ;;  %606 = vmatpush3.msra.mxu0 %v70_v49  ;;  %v164_v11 = vld [vmem:[#allocation5 + $0x308] sm:$0xff]  ;;  %v143_v13 = vld [vmem:[#allocation5 + $0x260] sm:$0xff]  ;;  %v142_v17 = vld [vmem:[#allocation5 + $0x258] sm:$0xff] }
  0x40   :  { %640 = vmatprep.subr.mxu1 %v118_v50  ;;  %607 = vmatprep.subr.mxu0 %v85_v51  ;;  %v163_v15 = vld [vmem:[#allocation5 + $0x300] sm:$0xff]  ;;  %v66_v18 = vld [vmem:[#allocation2 + $0x30] sm:$0xff]  ;;  %v157_v19 = vld [vmem:[#allocation5 + $0x2d0] sm:$0xff] }
  0x41   :  { %641 = vmatpush3.msra.mxu1 %v102_v52  ;;  %608 = vmatpush3.msra.mxu0 %v69_v53  ;;  %v141_v20 = vld [vmem:[#allocation5 + $0x250] sm:$0xff]  ;;  %v156_v21 = vld [vmem:[#allocation5 + $0x2c8] sm:$0xff]  ;;  %v155_v23 = vld [vmem:[#allocation5 + $0x2c0] sm:$0xff] }
  0x42   :  { %642 = vmatprep.subr.mxu1 %v117_v54  ;;  %609 = vmatprep.subr.mxu0 %v84_v55  ;;  %v140_v22 = vld [vmem:[#allocation5 + $0x248] sm:$0xff]  ;;  %v139_v24 = vld [vmem:[#allocation5 + $0x240] sm:$0xff]  ;;  %v154_v25 = vld [vmem:[#allocation5 + $0x2b8] sm:$0xff] }
  0x43   :  { %643 = vmatpush3.msra.mxu1 %v101_v56  ;;  %610 = vmatpush3.msra.mxu0 %v68_v57  ;;  %v138_v26 = vld [vmem:[#allocation5 + $0x238] sm:$0xff]  ;;  %v153_v27 = vld [vmem:[#allocation5 + $0x2b0] sm:$0xff]  ;;  %v152_v29 = vld [vmem:[#allocation5 + $0x2a8] sm:$0xff] }
  0x44   :  { %644 = vmatprep.subr.mxu1 %v116_v58  ;;  %611 = vmatprep.subr.mxu0 %v83_v59  ;;  %v137_v28 = vld [vmem:[#allocation5 + $0x230] sm:$0xff]  ;;  %v136_v30 = vld [vmem:[#allocation5 + $0x228] sm:$0xff]  ;;  %v151_v31 = vld [vmem:[#allocation5 + $0x2a0] sm:$0xff] }
  0x45   :  { %240 = vmatprep.mubr.f32.mxu0 %v61_v60  ;;  %612 = vmatpush3.msra.mxu0 %v67_v61  ;;  %v135_v32 = vld [vmem:[#allocation5 + $0x220] sm:$0xff]  ;;  %v150_v33 = vld [vmem:[#allocation5 + $0x298] sm:$0xff]  ;;  %v149_v35 = vld [vmem:[#allocation5 + $0x290] sm:$0xff] }
  0x46   :  { %645 = vmatpush3.msra.mxu1 %v100_v62  ;;  %241 = vmatmul.mubr.f32.vlgmr.msra.gmra.mxu0 %v60_v63  ;;  %v134_v34 = vld [vmem:[#allocation5 + $0x218] sm:$0xff]  ;;  %v133_v36 = vld [vmem:[#allocation5 + $0x210] sm:$0xff]  ;;  %v148_v37 = vld [vmem:[#allocation5 + $0x288] sm:$0xff] }
  0x47   :  { %646 = vmatprep.subr.mxu1 %v115_v0  ;;  %651 = vmatprep.subr.mxu0 %v162_v1  ;;  %v132_v38 = vld [vmem:[#allocation5 + $0x208] sm:$0xff]  ;;  %v147_v39 = vld [vmem:[#allocation5 + $0x280] sm:$0xff]  ;;  %v470_v44 = vld [vmem:[#allocation7 + $0x68] sm:$0xff] }
  0x48   :  { %647 = vmatpush3.msra.mxu1 %v99_v2  ;;  %310 = vmatprep.mubr.f32.mxu1 %v63_v3  ;;  %v131_v40 = vld [vmem:[#allocation5 + $0x200] sm:$0xff]  ;;  %v64_v41 = vld [vmem:[#allocation2 + $0x20] sm:$0xff]  ;;  %v469_v45 = vld [vmem:[#allocation7 + $0x60] sm:$0xff] }
  0x49   :  { %652 = vmatpush3.msra.mxu0 %v146_v4  ;;  %311 = vmatmul.mubr.f32.vlgmr.msra.gmra.mxu1 %v62_v5  ;;  %v472_v42 = vld [vmem:[#allocation7 + $0x78] sm:$0xff]  ;;  %v471_v43 = vld [vmem:[#allocation7 + $0x70] sm:$0xff]  ;;  %v466_v48 = vld [vmem:[#allocation7 + $0x48] sm:$0xff] }
  0x4a   :  { %653 = vmatprep.subr.mxu0 %v161_v6  ;;  %380 = vmatprep.mubr.f32.mxu0 %v65_v8  ;;  %v468_v46 = vld [vmem:[#allocation7 + $0x58] sm:$0xff]  ;;  %v467_v47 = vld [vmem:[#allocation7 + $0x50] sm:$0xff]  ;;  %v465_v49 = vld [vmem:[#allocation7 + $0x40] sm:$0xff] }
  0x4b   :  { %654 = vmatpush3.msra.mxu0 %v145_v7  ;;  %706 = vmatprep.subr.mxu1 %v851_v14  ;;  %v464_v50 = vld [vmem:[#allocation7 + $0x38] sm:$0xff]  ;;  %v463_v51 = vld [vmem:[#allocation7 + $0x30] sm:$0xff]  ;;  %v462_v52 = vld [vmem:[#allocation7 + $0x28] sm:$0xff] }
  0x4c   :  { %655 = vmatprep.subr.mxu0 %v160_v9  ;;  %707 = vmatpush3.msra.mxu1 %v164_v11  ;;  %v461_v53 = vld [vmem:[#allocation7 + $0x20] sm:$0xff]  ;;  %v460_v54 = vld [vmem:[#allocation7 + $0x18] sm:$0xff]  ;;  %v459_v55 = vld [vmem:[#allocation7 + $0x10] sm:$0xff] }
  0x4d   :  { %656 = vmatpush3.msra.mxu0 %v144_v10  ;;  %708 = vmatprep.subr.mxu1 %v851_v14  ;;  %v458_v56 = vld [vmem:[#allocation7 + $0x8] sm:$0xff]  ;;  %v457_v57 = vld [vmem:[#allocation7] sm:$0xff]  ;;  %v578_v1 = vld [vmem:[%s924_s2] ss:$0 sm:$0xff]  ;;  %s853_s2 = smov [#allocation8]  }
  0x4e   :  { %657 = vmatprep.subr.mxu0 %v159_v12  ;;  %709 = vmatpush3.msra.mxu1 %v163_v15  ;;  %v580_v11 = vld [vmem:[%s926_s4] ss:$0 sm:$0xff]  ;;  %s568_s11 = sshll.u32 %s853_s2, 4  ;;  %s569_s11 = int_to_ptr.vmem [resolvable:$true] %s568_s11 }
  0x4f   :  { %658 = vmatpush3.msra.mxu0 %v143_v13  ;;  %710 = vmatprep.mubr.msk.f32.mxu1 %vm852_vm1, %v851_v14  ;;  %s820_s4 = scalar_lea.vmem %s569_s11, 128  ;;  %p825_p2 = scmp.lt.s32.totalorder %s569_s11, %s569_s11 }
  0x50   :  { %659 = vmatprep.subr.mxu0 %v158_v16  ;;  %711 = vmatmul.mubr.msk.f32.vlgmr.msra.gmra.mxu1 %vm172_vm0, %v66_v18  ;;  %p821_p1 = scmp.ne.s32.totalorder %s569_s11, %s820_s4  ;;  %p826_p3 = scmp.lt.s32.totalorder %s820_s4, %s820_s4 }
  0x51   :  { %660 = vmatpush3.msra.mxu0 %v142_v17  ;;  %713 = vmatprep.subr.mxu1 %v851_v14 }
  0x52   :  { %661 = vmatprep.subr.mxu0 %v157_v19  ;;  %745 = vmatprep.mubr.msk.f32.mxu1 %vm852_vm1, %v851_v14  ;;  %p827_p4 = por %p826_p3, %p825_p2 }
  0x53   :  { %662 = vmatpush3.msra.mxu0 %v141_v20  ;;  %714 = vmatpush3.msra.mxu1 %v472_v42 }
  0x54   :  { %663 = vmatprep.subr.mxu0 %v156_v21  ;;  %715 = vmatprep.subr.mxu1 %v851_v14  ;;  %p828_p5 = pnand %p827_p4, %p821_p1 }
  0x55   :  { %664 = vmatpush3.msra.mxu0 %v140_v22  ;;  %716 = vmatpush3.msra.mxu1 %v471_v43 }
  0x56   :  { %665 = vmatprep.subr.mxu0 %v155_v23  ;;  %717 = vmatprep.subr.mxu1 %v851_v14 }
  0x57   :  { %666 = vmatpush3.msra.mxu0 %v139_v24  ;;  %718 = vmatpush3.msra.mxu1 %v470_v44 }
  0x58   :  { %667 = vmatprep.subr.mxu0 %v154_v25  ;;  %719 = vmatprep.subr.mxu1 %v851_v14 }
  0x59   :  { %668 = vmatpush3.msra.mxu0 %v138_v26  ;;  %720 = vmatpush3.msra.mxu1 %v469_v45 }
  0x5a   :  { %669 = vmatprep.subr.mxu0 %v153_v27  ;;  %721 = vmatprep.subr.mxu1 %v851_v14 }
  0x5b   :  { %670 = vmatpush3.msra.mxu0 %v137_v28  ;;  %722 = vmatpush3.msra.mxu1 %v468_v46 }
  0x5c   :  { %671 = vmatprep.subr.mxu0 %v152_v29  ;;  %723 = vmatprep.subr.mxu1 %v851_v14 }
  0x5d   :  { %672 = vmatpush3.msra.mxu0 %v136_v30  ;;  %724 = vmatpush3.msra.mxu1 %v467_v47 }
  0x5e   :  { %673 = vmatprep.subr.mxu0 %v151_v31  ;;  %725 = vmatprep.subr.mxu1 %v851_v14 }
  0x5f   :  { %674 = vmatpush3.msra.mxu0 %v135_v32  ;;  %726 = vmatpush3.msra.mxu1 %v466_v48 }
  0x60   :  { %675 = vmatprep.subr.mxu0 %v150_v33  ;;  %727 = vmatprep.subr.mxu1 %v851_v14 }
  0x61   :  { %676 = vmatpush3.msra.mxu0 %v134_v34  ;;  %728 = vmatpush3.msra.mxu1 %v465_v49 }
  0x62   :  { %677 = vmatprep.subr.mxu0 %v149_v35  ;;  %729 = vmatprep.subr.mxu1 %v851_v14 }
  0x63   :  { %678 = vmatpush3.msra.mxu0 %v133_v36  ;;  %730 = vmatpush3.msra.mxu1 %v464_v50 }
  0x64   :  { %679 = vmatprep.subr.mxu0 %v148_v37  ;;  %731 = vmatprep.subr.mxu1 %v851_v14 }
  0x65   :  { %680 = vmatpush3.msra.mxu0 %v132_v38  ;;  %732 = vmatpush3.msra.mxu1 %v463_v51 }
  0x66   :  { %681 = vmatprep.subr.mxu0 %v147_v39  ;;  %733 = vmatprep.subr.mxu1 %v851_v14 }
  0x67   :  { %682 = vmatpush3.msra.mxu0 %v131_v40  ;;  %734 = vmatpush3.msra.mxu1 %v462_v52 }
  0x68   :  { %381 = vmatmul.mubr.f32.vlgmr.msra.gmra.mxu0 %v64_v41  ;;  %735 = vmatprep.subr.mxu1 %v851_v14 }
  0x69   :  { %736 = vmatpush3.msra.mxu1 %v461_v53 }
  0x6a   :  { %737 = vmatprep.subr.mxu1 %v851_v14 }
  0x6b   :  { %738 = vmatpush3.msra.mxu1 %v460_v54 }
  0x6c   :  { %739 = vmatprep.subr.mxu1 %v851_v14 }
  0x6d   :  { %740 = vmatpush3.msra.mxu1 %v459_v55 }
  0x6e   :  { %741 = vmatprep.subr.mxu1 %v851_v14 }
  0x6f   :  { %742 = vmatpush3.msra.mxu1 %v458_v56 }
  0x70   :  { %743 = vmatprep.subr.mxu1 %v851_v14 }
  0x71   :  { %744 = vmatpush3.msra.mxu1 %v457_v57 }
 0x106   :  { %v613_v62 = vpop.f32.mrf.mxu0 }
 0x108   :  { %v614_v63 = vpop.f32.mrf.mxu0 }
 0x109   :  { %v648_v58 = vpop.f32.mrf.mxu1  ;;  %v615_v0 = vadd.f32 %v614_v63, %v613_v62 }
 0x10b   :  { %v649_v59 = vpop.f32.mrf.mxu1  ;;  %v243_v2 = vadd.f32 %v615_v0, %v578_v1 }
 0x10c   :  { %v650_v3 = vadd.f32 %v649_v59, %v648_v58 }
 0x10e   :  { %v313_v6 = vadd.f32 %v650_v3, %v243_v2 }
 0x110   :  { %v452_v60 = vpop.f32.mrf.mxu1 }
 0x112   :  { %v712_v61 = vpop.f32.mrf.mxu1 }
 0x128   :  { %v683_v4 = vpop.f32.mrf.mxu0 }
 0x12a   :  { %v684_v5 = vpop.f32.mrf.mxu0 }
 0x12b   :  { %v685_v7 = vadd.f32 %v684_v5, %v683_v4 }
 0x12d   :  { %v383_v8 = vadd.f32 %v685_v7, %v313_v6 }
 0x12f   :  { %v453_v9 = vadd.f32 %v452_v60, %v383_v8 }
 0x131   :  { %v456_v10 = vmax.f32 %v453_v9, 0.0 }
 0x133   :  { %746 = vmatmul.mubr.f32.vlgmr.msra.gmra.mxu1 %v456_v10 }
 0x1f3   :  { %v546_v12 = vpop.f32.mrf.mxu1 }
 0x1f4   :  { %v547_v13 = vadd.f32 %v580_v11, %v546_v12 }
 0x1f5   :  { %v747_v14 = vpop.f32.mrf.mxu1 }
 0x1f6   :  { %550 = vmax.xlane.f32.xlu0 %v547_v13 }
 0x27f   :  { %v551_v15 = vpop.xlane.xlu0 %550 }
 0x280   :  { %v552_v16 = vsub.f32 %v547_v13, %v551_v15 }
 0x282   :  { %v553_v17 = vmul.f32 1.442695, %v552_v16 }
 0x284   :  { %756 = vpow2.f32 %v553_v17 }
 0x291   :  { %v757_v18 = vpop.eup %756 }
 0x292   :  { %555 = vadd.xlane.f32.xlu0 %v757_v18 }
 0x31b   :  { %v556_v19 = vpop.xlane.xlu0 %555 }
 0x31c   :  { %758 = vlog2.f32 %v556_v19 }
 0x329   :  { %v759_v20 = vpop.eup %758 }
 0x32a   :  { %v558_v21 = vmul.f32 0.6931472, %v759_v20 }
 0x32c   :  { %v559_v22 = vsub.f32 %v552_v16, %v558_v21 }
 0x32e   :  { %561 = vst.msk [vmem:[#allocation8] sm:$0xff] %vm560_vm2, %v559_v22 }
 0x32f   :  { %831 = shalt.err (!%p828_p5)
}
 0x330   :  { %571 = dma.vmem_to_hbm [thread:$0]  %s569_s11, 128, %s927_s5, [#allocation4]  }
 0x331   :  { %844 = dma.done.wait [#allocation4], 128  }
 0x332   :  { %845 = vsyncadd [#allocation4], 4294967168 }
 0x333   :  { %575 = vsyncpa [#allocation3], 1 }
 0x334   :  { %576 = vsyncpa [#allocation6], 1 }
 0x335   :  { %577 = vsyncpa [#allocation4], 1 }

</bundles_post_ra>
